<compile_context>
chip_gen: v6e
topology: v6e:2x2x1
jax: 0.10.0
libtpu: 0.0.40
codegen_flags: <defaults>
</compile_context>

<pallas_src>
import functools

import jax
import jax.numpy as jnp
from jax import lax
from jax.experimental import pallas as pl
from jax.experimental.pallas import tpu as pltpu

LANE = 128


def _round_up(x, m):
    return ((x + m - 1) // m) * m


def _choose_tl(n_batch, length, tl_max=2048):
    """Pick the L-tile (multiple of 128 -> lane-dense output).  Preference:
    minimal padded length, then an even total grid count (v7x megacore),
    then the largest tile (fewer grid steps)."""
    cap = max(LANE, min(tl_max, _round_up(length, LANE)))
    best_key, best_tl = None, cap
    for tl in range(LANE, cap + 1, LANE):
        n_tiles = pl.cdiv(length, tl)
        padded = n_tiles * tl
        steps = n_batch * n_tiles
        key = (padded, steps % 2, -tl)
        if best_key is None or key < best_key:
            best_key, best_tl = key, tl
    return best_tl


# ----------------------------------------------------------------------------
# Fused Pallas kernel: all ConvBNReLURes1D blocks, BN folded into W/b.
# Block of x: (C, tl)  (batch dim squeezed);  w1: (B, Ch, C);  w2: (B, C, Ch).
# ----------------------------------------------------------------------------
def _pos_extraction_kernel(x_ref, w1_ref, b1_ref, w2_ref, b2_ref, o_ref, *,
                           blocks, unroll):
    x0 = x_ref[...].astype(jnp.float32)                  # (C, tl) f32

    def block_body(blk, x):
        # net1: 1x1 conv (BN1 folded) + ReLU   -> contraction over channels
        h = jnp.dot(w1_ref[blk], x, preferred_element_type=jnp.float32)
        h = jnp.maximum(h + b1_ref[blk], 0.0)            # (Ch, tl)
        # net2: 1x1 conv (BN2 folded)
        y = jnp.dot(w2_ref[blk], h, preferred_element_type=jnp.float32)
        y = y + b2_ref[blk]                              # (C, tl)
        # residual + final activation
        return jnp.maximum(y + x, 0.0)

    x = lax.fori_loop(0, blocks, block_body, x0, unroll=unroll)
    o_ref[...] = x.astype(o_ref.dtype)


@jax.jit
def pos_extraction_forward(x_ncl, w1s, b1s, w2s, b2s):
    """x_ncl: (N, C, L), same layout as the PyTorch module.  Returns (N, C, L)."""
    N, C, L = x_ncl.shape
    B, Ch, C_in = w1s.shape
    assert C_in == C and w2s.shape == (B, C, Ch)

    tl = _choose_tl(N, L)
    Lp = pl.cdiv(L, tl) * tl
    x_p = x_ncl if Lp == L else jnp.pad(x_ncl, ((0, 0), (0, 0), (0, Lp - L)))
    grid = (N, Lp // tl)

    # Explicit VMEM limit (review): clamp to v7x's 64 MiB physical VMEM.
    itemsize = jnp.dtype(x_ncl.dtype).itemsize
    weight_bytes = sum(int(a.size) * jnp.dtype(a.dtype).itemsize
                       for a in (w1s, b1s, w2s, b2s))
    est = (4 * C * tl * itemsize          # in + out tiles, double-buffered
           + 2 * weight_bytes             # resident stacks (double-buffered)
           + 8 * C * tl * 4)              # f32 temporaries in the block loop
    vmem_limit = int(min(64 << 20, max(32 << 20, 2 * est)))

    kernel = functools.partial(_pos_extraction_kernel, blocks=B,
                               unroll=(B <= 4))
    out = pl.pallas_call(
        kernel,
        out_shape=jax.ShapeDtypeStruct((N, C, Lp), x_ncl.dtype),
        grid_spec=pltpu.PrefetchScalarGridSpec(
            num_scalar_prefetch=0,
            grid=grid,
            in_specs=[
                pl.BlockSpec((None, C, tl), lambda n, l: (n, 0, l)),   # x tile
                pl.BlockSpec((B, Ch, C), lambda n, l: (0, 0, 0)),      # W1 stack
                pl.BlockSpec((B, Ch, 1), lambda n, l: (0, 0, 0)),      # b1 stack
                pl.BlockSpec((B, C, Ch), lambda n, l: (0, 0, 0)),      # W2 stack
                pl.BlockSpec((B, C, 1), lambda n, l: (0, 0, 0)),       # b2 stack
            ],
            out_specs=pl.BlockSpec((None, C, tl), lambda n, l: (n, 0, l)),
        ),
        compiler_params=pltpu.CompilerParams(
            dimension_semantics=("parallel", "parallel"),
            vmem_limit_bytes=vmem_limit),
    )(x_p, w1s, b1s, w2s, b2s)

    return out if Lp == L else out[:, :, :L]


# ----------------------------------------------------------------------------
# Parameter construction (deterministic) + inference-mode BN folding.
# Conv weights are kept in PyTorch Conv1d orientation: (Cout, Cin).
# ----------------------------------------------------------------------------
def _fold_bn(w, b, gamma, beta, mean, var, eps=1e-5):
    """Fold inference-mode BatchNorm1d into a pointwise conv (w: [Cout, Cin])."""
    s = gamma / jnp.sqrt(var + eps)
    return w * s[:, None], b * s + (beta - mean * s)


def make_pos_extraction_params(key, channels, blocks=1, res_expansion=1.0):
    """Deterministic Conv1d+BN params per block, BN folded.  Returns a list of
    f32 tuples (w1, b1, w2, b2) with w1: (Ch, C), w2: (C, Ch), b: (Cout,)."""
    hidden = int(channels * res_expansion)
    folded = []
    for blk in range(blocks):
        ks = jax.random.split(jax.random.fold_in(key, blk), 12)
        w1 = jax.random.normal(ks[0], (hidden, channels), jnp.float32) * 0.1
        b1 = jax.random.normal(ks[1], (hidden,), jnp.float32) * 0.1
        w2 = jax.random.normal(ks[2], (channels, hidden), jnp.float32) * 0.1
        b2 = jax.random.normal(ks[3], (channels,), jnp.float32) * 0.1
        g1 = 1.0 + 0.1 * jax.random.normal(ks[4], (hidden,), jnp.float32)
        be1 = 0.1 * jax.random.normal(ks[5], (hidden,), jnp.float32)
        m1 = 0.05 * jax.random.normal(ks[6], (hidden,), jnp.float32)
        v1 = 0.5 + jax.random.uniform(ks[7], (hidden,), jnp.float32)
        g2 = 1.0 + 0.1 * jax.random.normal(ks[8], (channels,), jnp.float32)
        be2 = 0.1 * jax.random.normal(ks[9], (channels,), jnp.float32)
        m2 = 0.05 * jax.random.normal(ks[10], (channels,), jnp.float32)
        v2 = 0.5 + jax.random.uniform(ks[11], (channels,), jnp.float32)
        w1f, b1f = _fold_bn(w1, b1, g1, be1, m1, v1)
        w2f, b2f = _fold_bn(w2, b2, g2, be2, m2, v2)
        folded.append((w1f, b1f, w2f, b2f))
    return folded


def stack_params(folded):
    """Stack per-block folded params in the kernel's orientation:
    w1s: (B, Ch, C), b1s: (B, Ch, 1), w2s: (B, C, Ch), b2s: (B, C, 1).
    No channel padding (keeps weight bytes and per-block MXU work minimal)."""
    w1s = jnp.stack([w1 for (w1, _, _, _) in folded]).astype(jnp.float32)
    b1s = jnp.stack([b1[:, None] for (_, b1, _, _) in folded]).astype(jnp.float32)
    w2s = jnp.stack([w2 for (_, _, w2, _) in folded]).astype(jnp.float32)
    b2s = jnp.stack([b2[:, None] for (_, _, _, b2) in folded]).astype(jnp.float32)
    return w1s, b1s, w2s, b2s


# ----------------------------------------------------------------------------
# Pure-JAX reference (exact f32 PyTorch semantics with BN folded).
# ----------------------------------------------------------------------------
def pos_extraction_ref(x_ncl, folded):
    hi = jax.lax.Precision.HIGHEST
    x = x_ncl.astype(jnp.float32)
    for (w1, b1, w2, b2) in folded:
        h = jnp.einsum('hc,ncl->nhl', w1, x, precision=hi) + b1[None, :, None]
        h = jnp.maximum(h, 0.0)
        y = jnp.einsum('ch,nhl->ncl', w2, h, precision=hi) + b2[None, :, None]
        x = jnp.maximum(y + x, 0.0)
    return x


if __name__ == "__main__":
    key = jax.random.PRNGKey(0)
    N, C, L = 2, 32, 256          # small shapes: batch=2, channels=32, points=256
    blocks = 2

    k_x, k_p = jax.random.split(key)
    x = jax.random.normal(k_x, (N, C, L), jnp.float32)
    folded = make_pos_extraction_params(k_p, channels=C, blocks=blocks,
                                        res_expansion=1.0)
    w1s, b1s, w2s, b2s = stack_params(folded)

    out = pos_extraction_forward(x, w1s, b1s, w2s, b2s)
    out = jax.block_until_ready(out)
    assert out.shape == (N, C, L)
    assert out.dtype == x.dtype

    ref = pos_extraction_ref(x, folded)
    assert jnp.allclose(out, ref, atol=2e-3, rtol=2e-3), \
        "mismatch vs f32 reference"

    print("KERNEL_OK")
</pallas_src>

<mosaic_0001>
module attributes {stable_mosaic.version = 11 : i64} {
  func.func @_pos_extraction_kernel(%arg0: i32, %arg1: i32, %arg2: memref<1x32x256xf32, #tpu.memory_space<vmem>>, %arg3: memref<2x32x32xf32, #tpu.memory_space<vmem>>, %arg4: memref<2x32x1xf32, #tpu.memory_space<vmem>>, %arg5: memref<2x32x32xf32, #tpu.memory_space<vmem>>, %arg6: memref<2x32x1xf32, #tpu.memory_space<vmem>>, %arg7: memref<1x32x256xf32, #tpu.memory_space<vmem>>) attributes {dimension_semantics = [#tpu.dimension_semantics<parallel>, #tpu.dimension_semantics<parallel>], iteration_bounds = array<i64: 2, 1>, scalar_prefetch = 0 : i64, scratch_operands = 0 : i64, tpu.core_type = #tpu.core_type<tc>, window_params = [{transform_indices = @transform_0, window_bounds = array<i64: 1, 32, 256>}, {pipeline_mode = #tpu.pipeline_mode<synchronous>, transform_indices = @transform_1, window_bounds = array<i64: 2, 32, 32>}, {pipeline_mode = #tpu.pipeline_mode<synchronous>, transform_indices = @transform_2, window_bounds = array<i64: 2, 32, 1>}, {pipeline_mode = #tpu.pipeline_mode<synchronous>, transform_indices = @transform_3, window_bounds = array<i64: 2, 32, 32>}, {pipeline_mode = #tpu.pipeline_mode<synchronous>, transform_indices = @transform_4, window_bounds = array<i64: 2, 32, 1>}, {transform_indices = @transform_5, window_bounds = array<i64: 1, 32, 256>}]} {
    %c0 = arith.constant 0 : index
    %c0_0 = arith.constant 0 : index
    %c0_1 = arith.constant 0 : index
    %0 = vector.load %arg2[%c0, %c0_0, %c0_1] : memref<1x32x256xf32, #tpu.memory_space<vmem>>, vector<1x32x256xf32>
    %1 = vector.shape_cast %0 : vector<1x32x256xf32> to vector<32x256xf32>
    %c0_i32 = arith.constant 0 : i32
    %2 = arith.index_cast %c0_i32 : i32 to index
    %c0_2 = arith.constant 0 : index
    %c0_3 = arith.constant 0 : index
    %3 = vector.load %arg3[%2, %c0_2, %c0_3] : memref<2x32x32xf32, #tpu.memory_space<vmem>>, vector<1x32x32xf32>
    %4 = vector.shape_cast %3 : vector<1x32x32xf32> to vector<32x32xf32>
    %cst = arith.constant dense<0.000000e+00> : vector<32x256xf32>
    %5 = tpu.matmul %4, %1, %cst {dimension_numbers = #tpu.dot_dimension_numbers<[1], [0], [0], [1], [0, 0, 1, 1], [], []>} : vector<32x32xf32>, vector<32x256xf32>, vector<32x256xf32> -> vector<32x256xf32>
    %6 = arith.index_cast %c0_i32 : i32 to index
    %c0_4 = arith.constant 0 : index
    %c0_5 = arith.constant 0 : index
    %7 = vector.load %arg4[%6, %c0_4, %c0_5] : memref<2x32x1xf32, #tpu.memory_space<vmem>>, vector<1x32x1xf32>
    %8 = vector.shape_cast %7 : vector<1x32x1xf32> to vector<32x1xf32>
    %9 = vector.broadcast %8 : vector<32x1xf32> to vector<32x256xf32>
    %10 = arith.addf %5, %9 : vector<32x256xf32>
    %cst_6 = arith.constant 0.000000e+00 : f32
    %11 = vector.broadcast %cst_6 : f32 to vector<32x256xf32>
    %12 = arith.maximumf %10, %11 : vector<32x256xf32>
    %13 = arith.index_cast %c0_i32 : i32 to index
    %c0_7 = arith.constant 0 : index
    %c0_8 = arith.constant 0 : index
    %14 = vector.load %arg5[%13, %c0_7, %c0_8] : memref<2x32x32xf32, #tpu.memory_space<vmem>>, vector<1x32x32xf32>
    %15 = vector.shape_cast %14 : vector<1x32x32xf32> to vector<32x32xf32>
    %cst_9 = arith.constant dense<0.000000e+00> : vector<32x256xf32>
    %16 = tpu.matmul %15, %12, %cst_9 {dimension_numbers = #tpu.dot_dimension_numbers<[1], [0], [0], [1], [0, 0, 1, 1], [], []>} : vector<32x32xf32>, vector<32x256xf32>, vector<32x256xf32> -> vector<32x256xf32>
    %17 = arith.index_cast %c0_i32 : i32 to index
    %c0_10 = arith.constant 0 : index
    %c0_11 = arith.constant 0 : index
    %18 = vector.load %arg6[%17, %c0_10, %c0_11] : memref<2x32x1xf32, #tpu.memory_space<vmem>>, vector<1x32x1xf32>
    %19 = vector.shape_cast %18 : vector<1x32x1xf32> to vector<32x1xf32>
    %20 = vector.broadcast %19 : vector<32x1xf32> to vector<32x256xf32>
    %21 = arith.addf %16, %20 : vector<32x256xf32>
    %22 = arith.addf %21, %1 : vector<32x256xf32>
    %cst_12 = arith.constant 0.000000e+00 : f32
    %23 = vector.broadcast %cst_12 : f32 to vector<32x256xf32>
    %24 = arith.maximumf %22, %23 : vector<32x256xf32>
    %c1_i32 = arith.constant 1 : i32
    %25 = arith.index_cast %c1_i32 : i32 to index
    %c0_13 = arith.constant 0 : index
    %c0_14 = arith.constant 0 : index
    %26 = vector.load %arg3[%25, %c0_13, %c0_14] : memref<2x32x32xf32, #tpu.memory_space<vmem>>, vector<1x32x32xf32>
    %27 = vector.shape_cast %26 : vector<1x32x32xf32> to vector<32x32xf32>
    %cst_15 = arith.constant dense<0.000000e+00> : vector<32x256xf32>
    %28 = tpu.matmul %27, %24, %cst_15 {dimension_numbers = #tpu.dot_dimension_numbers<[1], [0], [0], [1], [0, 0, 1, 1], [], []>} : vector<32x32xf32>, vector<32x256xf32>, vector<32x256xf32> -> vector<32x256xf32>
    %29 = arith.index_cast %c1_i32 : i32 to index
    %c0_16 = arith.constant 0 : index
    %c0_17 = arith.constant 0 : index
    %30 = vector.load %arg4[%29, %c0_16, %c0_17] : memref<2x32x1xf32, #tpu.memory_space<vmem>>, vector<1x32x1xf32>
    %31 = vector.shape_cast %30 : vector<1x32x1xf32> to vector<32x1xf32>
    %32 = vector.broadcast %31 : vector<32x1xf32> to vector<32x256xf32>
    %33 = arith.addf %28, %32 : vector<32x256xf32>
    %cst_18 = arith.constant 0.000000e+00 : f32
    %34 = vector.broadcast %cst_18 : f32 to vector<32x256xf32>
    %35 = arith.maximumf %33, %34 : vector<32x256xf32>
    %36 = arith.index_cast %c1_i32 : i32 to index
    %c0_19 = arith.constant 0 : index
    %c0_20 = arith.constant 0 : index
    %37 = vector.load %arg5[%36, %c0_19, %c0_20] : memref<2x32x32xf32, #tpu.memory_space<vmem>>, vector<1x32x32xf32>
    %38 = vector.shape_cast %37 : vector<1x32x32xf32> to vector<32x32xf32>
    %cst_21 = arith.constant dense<0.000000e+00> : vector<32x256xf32>
    %39 = tpu.matmul %38, %35, %cst_21 {dimension_numbers = #tpu.dot_dimension_numbers<[1], [0], [0], [1], [0, 0, 1, 1], [], []>} : vector<32x32xf32>, vector<32x256xf32>, vector<32x256xf32> -> vector<32x256xf32>
    %40 = arith.index_cast %c1_i32 : i32 to index
    %c0_22 = arith.constant 0 : index
    %c0_23 = arith.constant 0 : index
    %41 = vector.load %arg6[%40, %c0_22, %c0_23] : memref<2x32x1xf32, #tpu.memory_space<vmem>>, vector<1x32x1xf32>
    %42 = vector.shape_cast %41 : vector<1x32x1xf32> to vector<32x1xf32>
    %43 = vector.broadcast %42 : vector<32x1xf32> to vector<32x256xf32>
    %44 = arith.addf %39, %43 : vector<32x256xf32>
    %45 = arith.addf %44, %24 : vector<32x256xf32>
    %cst_24 = arith.constant 0.000000e+00 : f32
    %46 = vector.broadcast %cst_24 : f32 to vector<32x256xf32>
    %47 = arith.maximumf %45, %46 : vector<32x256xf32>
    %c2_i32 = arith.constant 2 : i32
    %c0_25 = arith.constant 0 : index
    %c0_26 = arith.constant 0 : index
    %c0_27 = arith.constant 0 : index
    %48 = vector.load %arg7[%c0_25, %c0_26, %c0_27] : memref<1x32x256xf32, #tpu.memory_space<vmem>>, vector<1x32x256xf32>
    %49 = vector.shape_cast %48 : vector<1x32x256xf32> to vector<32x256xf32>
    %50 = vector.shape_cast %47 : vector<32x256xf32> to vector<1x32x256xf32>
    tpu.vector_store %arg7[%c0_25, %c0_26, %c0_27], %50 {strides = array<i32>} : memref<1x32x256xf32, #tpu.memory_space<vmem>>, vector<1x32x256xf32>,
    return
  }
  func.func @transform_0(%arg0: i32, %arg1: i32) -> (i32, i32, i32) {
    %c0_i32 = arith.constant 0 : i32
    %c0_i32_0 = arith.constant 0 : i32
    return %arg0, %c0_i32, %arg1 : i32, i32, i32
  }
  func.func @transform_1(%arg0: i32, %arg1: i32) -> (i32, i32, i32) {
    %c0_i32 = arith.constant 0 : i32
    %c0_i32_0 = arith.constant 0 : i32
    %c0_i32_1 = arith.constant 0 : i32
    %c0_i32_2 = arith.constant 0 : i32
    return %c0_i32, %c0_i32_0, %c0_i32_1 : i32, i32, i32
  }
  func.func @transform_2(%arg0: i32, %arg1: i32) -> (i32, i32, i32) {
    %c0_i32 = arith.constant 0 : i32
    %c0_i32_0 = arith.constant 0 : i32
    %c0_i32_1 = arith.constant 0 : i32
    %c0_i32_2 = arith.constant 0 : i32
    return %c0_i32, %c0_i32_0, %c0_i32_1 : i32, i32, i32
  }
  func.func @transform_3(%arg0: i32, %arg1: i32) -> (i32, i32, i32) {
    %c0_i32 = arith.constant 0 : i32
    %c0_i32_0 = arith.constant 0 : i32
    %c0_i32_1 = arith.constant 0 : i32
    %c0_i32_2 = arith.constant 0 : i32
    return %c0_i32, %c0_i32_0, %c0_i32_1 : i32, i32, i32
  }
  func.func @transform_4(%arg0: i32, %arg1: i32) -> (i32, i32, i32) {
    %c0_i32 = arith.constant 0 : i32
    %c0_i32_0 = arith.constant 0 : i32
    %c0_i32_1 = arith.constant 0 : i32
    %c0_i32_2 = arith.constant 0 : i32
    return %c0_i32, %c0_i32_0, %c0_i32_1 : i32, i32, i32
  }
  func.func @transform_5(%arg0: i32, %arg1: i32) -> (i32, i32, i32) {
    %c0_i32 = arith.constant 0 : i32
    %c0_i32_0 = arith.constant 0 : i32
    return %arg0, %c0_i32, %arg1 : i32, i32, i32
  }
}

</mosaic_0001>

<bundles_post_ra>
// kernel: pos_extraction_forward.1
= control target key start
LH: loop header
LB: loop body
LE: loop exit
PB: predicated region body
PF: predicated region fallthrough
CT: control target
= control target key end

     0   :  { %10 = vsyncpa [#allocation3], 0  ;;  %s1631_s0 = inlined_call_operand.vmem [shape: f32[2,32,256], index: 0, kind: input, shape index: {}]   ;;  %s1632_s1 = inlined_call_operand.hbm [shape: f32[2,32,32], index: 1, kind: input, shape index: {}]   ;;  %s1633_s2 = inlined_call_operand.vmem [shape: f32[2,32,1], index: 2, kind: input, shape index: {}]   ;;  %s1634_s3 = inlined_call_operand.hbm [shape: f32[2,32,32], index: 3, kind: input, shape index: {}]   ;;  %s1635_s4 = inlined_call_operand.vmem [shape: f32[2,32,1], index: 4, kind: input, shape index: {}]   ;;  %s1636_s5 = inlined_call_operand.hbm [shape: f32[2,32,256], index: 5, kind: output, shape index: {}]  }
   0x1   :  { %11 = vsyncpa [#allocation6], 0 }
   0x2   :  { %12 = vsyncpa [#allocation4], 0 }
   0x3   :  { %14 = vsyncpa [#allocation4 + $0x1], 0  ;;  %s1290_s18 = smov 0   ;;  %s1292_s19 = smov 0  }
   0x4   :  { %s1294_s20 = smov 0   ;;  %s1296_s21 = smov 0  }
   0x5   :  { %s1298_s22 = smov 0   ;;  %s1300_s23 = smov 0  }
   0x6 LB: > { %s986_s24 = sadd.s32 4294967295, %s1249_s23   ;;  %s987_s25 = sadd.s32 4294967294, %s1249_s23   ;;  %s1249_s23 = sphi %s1300_s23, %s20_s23   ;;  %s1245_s22 = sphi %s1298_s22, %s1649_s22   ;;  %s1241_s21 = sphi %s1296_s21, %s1648_s21   ;;  %s1237_s20 = sphi %s1294_s20, %s1647_s20   ;;  %s1233_s19 = sphi %s1292_s19, %s1646_s19   ;;  %s1229_s18 = sphi %s1290_s18, %s1645_s18  }
   0x7   : > { %s32_s26 = sadd.s32 1, %s1245_s22  ;;  %s153_s27 = sadd.s32 1, %s1237_s20 }
   0x8   : > { %p34_p0 = scmp.ge.s32.totalorder %s32_s26, 2  ;;  %p163_p1 = scmp.ne.s32.totalorder %s1237_s20, %s1233_s19 }
   0x9   : > { %p164_p2 = scmp.eq.s32.totalorder %s986_s24, 1  ;;  %p169_p3 = scmp.ne.s32.totalorder %s1233_s19, %s1229_s18 }
   0xa   : > { %s1651_s26 = smov (%p34_p0, %s32_s26), 0  ;;  %p170_p5 = scmp.eq.s32.totalorder %s987_s25, 1 }
   0xb   : > { %p1330_p4 = por %p164_p2, %p163_p1  ;;  %s148_s29 = ssub.s32 %s1245_s22, %s1651_s26 }
   0xc   : > { %p988_p6 = scmp.ge.s32.totalorder %s1249_s23, 1  ;;  %p151_p7 = scmp.eq.s32.totalorder %s148_s29, 0 }
   0xd   : > { %s1638_s28 = scalar_select %p1330_p4, 1, 0 }
   0xe   : > { %p1337_p8 = por %p170_p5, %p169_p3  ;;  %p177_p9 = scmp.lt.s32.totalorder %s1249_s23, 3 }
   0xf   : > { %s1343_s6 = scalar_select %p151_p7, %s1237_s20, %s153_s27  }
  0x10   : > { %s1639_s30 = scalar_select %p1337_p8, 1, 0 }
  0x11   : > { %p1345_p10 = pnand %p988_p6, %p177_p9  ;;  %p1349_p11 = scmp.eq.s32.totalorder %s986_s24, 0 }
  0x12   : > { %s1251_s9 = smov [#allocation2]   ;;  %s1252_s12 = smov [#allocation5]  }
  0x13   : > { %p1039_p12 = pneg %p1345_p10  ;;  %s189_s10 = sshll.u32 %s1251_s9, 4  ;;  %s190_s10 = int_to_ptr.vmem [resolvable:$true] %s189_s10 }
  0x14   : > { %s205_s13 = sshll.u32 %s1252_s12, 4  ;;  %s1124_s14 = scalar_lea.vmem %s190_s10, 1024  ;;  %s206_s13 = int_to_ptr.vmem [resolvable:$true] %s205_s13 }
  0x15   : > { %p1357_p13 = pnand %p1349_p11, %p1039_p12  ;;  %p1125_p1 = scmp.ne.s32.totalorder %s190_s10, %s1124_s14 }
  0x16   : > { %p1132_p5 = scmp.lt.s32.totalorder %s190_s10, %s190_s10  ;;  %p1133_p6 = scmp.lt.s32.totalorder %s1124_s14, %s1124_s14 }
  0x17   : > { %p1115_p0 = pneg %p1357_p13 }
  0x18   : > { %p1134_p7 = por %p1133_p6, %p1132_p5 }
  0x19   : > { %p1127_p2 = pnand %p1125_p1, %p1115_p0 }
  0x1b   : > { %p1128_p3 = pneg %p1127_p2 }
  0x1d   : > { %p1135_p9 = pnand %p1134_p7, %p1128_p3 }
  0x1f   : > { %1138 = shalt.err (!%p1135_p9)
}
  0x20   : > { %s1253_s15 = smov 128   ;;  %s1254_s16 = smov 8  }
  0x21   : > { %1042 = dma.hbm_to_vmem [thread:$0]  (!%p1357_p13), %s1632_s1, 1024, %s190_s10, [#allocation3], %s1253_s15, %s1253_s15, %s1254_s16  }
  0x22   : > { %s1150_s25 = scalar_lea.vmem %s206_s13, 1024  ;;  %p1158_p8 = scmp.lt.s32.totalorder %s206_s13, %s206_s13 }
  0x23   : > { %p1151_p12 = scmp.ne.s32.totalorder %s206_s13, %s1150_s25  ;;  %p1159_p4 = scmp.lt.s32.totalorder %s1150_s25, %s1150_s25 }
  0x25   : > { %p1153_p1 = pnand %p1151_p12, %p1115_p0  ;;  %p1160_p5 = por %p1159_p4, %p1158_p8 }
  0x27   : > { %p1154_p2 = pneg %p1153_p1 }
  0x29   : > { %p1161_p3 = pnand %p1160_p5, %p1154_p2 }
  0x2b   : > { %1164 = shalt.err (!%p1161_p3)
}
  0x2c   : > { %1045 = dma.hbm_to_vmem [thread:$0]  (!%p1357_p13), %s1634_s3, 1024, %s206_s13, [#allocation6], %s1253_s15, %s1253_s15, %s1254_s16  }
  0x2d   : > { %237 = sbr.rel (%p1345_p10) target bundleno = 954 (0x3ba), region = 40 }
  0x32   : > { %1216 = dma.done.wait (%p1349_p11), [#allocation3], 1024  }
  0x33   : > { %1218 = vsyncadd (%p1349_p11), [#allocation3], 4294966272 }
  0x34   : > { %1220 = dma.done.wait (%p1349_p11), [#allocation6], 1024  }
  0x35   : > { %1222 = vsyncadd (%p1349_p11), [#allocation6], 4294966272  ;;  %p274_p4 = scmp.lt.s32.totalorder %s1241_s21, 1  ;;  %v1255_v0 = vmov 0.0   ;;  %v1256_v1 = vmov 0   ;;  %v299_v9 = vld [vmem:[%s1633_s2 + $0x18] sm:$0xff] }
  0x36   : > { %397 = vmatprep.mubr.f32.mxu0 %v1255_v0  ;;  %1111 = vset.pattern.permute.xlu0 %v1256_v1  ;;  %v297_v10 = vld [vmem:[%s1633_s2 + $0x8] sm:$0xff]  ;;  %v292_v12 = vld [vmem:[#allocation2] sm:$0xff]  ;;  %vm320_vm0 = vcmask 261120   ;;  %v298_v13 = vld [vmem:[%s1633_s2 + $0x10] sm:$0xff]  ;;  %s270_s14 = sand.u32 1, %s1233_s19   ;;  %s1028_s24 = sshll.u32 %s1241_s21, 10 }
  0x37   : > { %s275_s7 = scalar_select %p274_p4, %s1241_s21, 1  ;;  %1112 = vset.pattern.permute.xlu1 %v1256_v1  ;;  %534 = vmatprep.mubr.f32.mxu1 %v1255_v0  ;;  %v296_v14 = vld [vmem:[%s1633_s2] sm:$0xff]  ;;  %v293_v15 = vld [vmem:[#allocation2 + $0x8] sm:$0xff]  ;;  %v437_v16 = vld [vmem:[%s1635_s4 + $0x18] sm:$0xff] }
  0x38   : > { %317 = vperm.xlu0 %1111, %v299_v9   ;;  %307 = vperm.xlu1 %1112, %v297_v10   ;;  %v436_v17 = vld [vmem:[%s1635_s4 + $0x10] sm:$0xff]  ;;  %v435_v19 = vld [vmem:[%s1635_s4 + $0x8] sm:$0xff]  ;;  %v434_v20 = vld [vmem:[%s1635_s4] sm:$0xff]  ;;  %s995_s15 = sshll.u32 %s270_s14, 6  ;;  %s1580_s29 = scalar_lea.hbm %s1636_s5, %s1028_s24 }
  0x39   : > { %s1027_s9 = sshll.u32 %s275_s7, 6  ;;  %v294_v18 = vld [vmem:[#allocation2 + $0x10] sm:$0xff]  ;;  %v295_v21 = vld [vmem:[#allocation2 + $0x18] sm:$0xff]  ;;  %v1007_v24 = vld [vmem:[%s1633_s2 + $0x28] sm:$0xff]  ;;  %s1553_s16 = scalar_lea.vmem [#allocation7], %s995_s15 }
  0x3a   : > { %s281_s12 = scalar_lea.vmem %s1631_s0, %s1027_s9  ;;  %v1009_v22 = vld [vmem:[%s1633_s2 + $0x38] sm:$0xff]  ;;  %v1008_v23 = vld [vmem:[%s1633_s2 + $0x30] sm:$0xff]  ;;  %v1006_v25 = vld [vmem:[%s1633_s2 + $0x20] sm:$0xff]  ;;  %s885_s17 = sshll.u32 %s1553_s16, 4  ;;  %s1575_s17 = int_to_ptr.vmem [resolvable:$true] %s885_s17 }
  0x3b   : > { %v1396_v2 = vld [vmem:[%s281_s12 + $0x38] sm:$0xff]  ;;  %v1398_v3 = vld [vmem:[%s281_s12 + $0x30] sm:$0xff]  ;;  %v1400_v4 = vld [vmem:[%s281_s12 + $0x28] sm:$0xff]  ;;  %s1586_s21 = scalar_lea.sflag [#allocation4], %s270_s14  ;;  %s1165_s7 = scalar_lea.vmem %s1575_s17, 1024 }
  0x3c   : > { %357 = vmatprep.subr.mxu0 %v1396_v2  ;;  %v1403_v5 = vld [vmem:[%s281_s12 + $0x20] sm:$0xff]  ;;  %v1406_v6 = vld [vmem:[%s281_s12 + $0x18] sm:$0xff]  ;;  %v1409_v7 = vld [vmem:[%s281_s12 + $0x10] sm:$0xff]  ;;  %312 = vperm.xlu0 %1111, %v298_v13   ;;  %p1166_p8 = scmp.ne.s32.totalorder %s1575_s17, %s1165_s7  ;;  %p1643_p10 = scmp.ne.s32.totalorder %s1638_s28, 0 }
  0x3d   : > { %358 = vmatpush1.msra.mxu0 %v1398_v3  ;;  %v1412_v8 = vld [vmem:[%s281_s12 + $0x8] sm:$0xff]  ;;  %v1421_v11 = vld [vmem:[%s281_s12] sm:$0xff]  ;;  %302 = vperm.xlu1 %1112, %v296_v14   ;;  %v1016_v28 = vld [vmem:[%s1635_s4 + $0x30] sm:$0xff]  ;;  %s1257_s9 = smov [#allocation7]  }
  0x3e   : > { %359 = vmatprep.subr.mxu0 %v1400_v4  ;;  %v1014_v26 = vld [vmem:[%s1635_s4 + $0x20] sm:$0xff]  ;;  %v1015_v27 = vld [vmem:[%s1635_s4 + $0x28] sm:$0xff]  ;;  %v1017_v29 = vld [vmem:[%s1635_s4 + $0x38] sm:$0xff]  ;;  %p1167_p11 = pnand %p1166_p8, %p1643_p10  ;;  %s1169_s10 = sshll.u32 %s1257_s9, 4  ;;  %s1170_s10 = int_to_ptr.vmem [resolvable:$false] %s1169_s10 }
  0x3f   : > { %360 = vmatpush1.msra.mxu0 %v1403_v5  ;;  %v430_v58 = vld [vmem:[#allocation5] sm:$0xff]  ;;  %v431_v59 = vld [vmem:[#allocation5 + $0x8] sm:$0xff]  ;;  %v432_v60 = vld [vmem:[#allocation5 + $0x10] sm:$0xff]  ;;  %s1171_s11 = scalar_lea.vmem %s1170_s10, 2048  ;;  %p1172_p0 = scmp.lt.s32.totalorder %s1575_s17, %s1170_s10 }
  0x40   : > { %361 = vmatprep.subr.mxu0 %v1406_v6  ;;  %455 = vperm.xlu0 %1111, %v437_v16   ;;  %v433_v61 = vld [vmem:[#allocation5 + $0x18] sm:$0xff]  ;;  %p1168_p13 = pneg %p1167_p11  ;;  %p1173_p6 = scmp.lt.s32.totalorder %s1171_s11, %s1165_s7 }
  0x41   : > { %362 = vmatpush1.msra.mxu0 %v1409_v7  ;;  %450 = vperm.xlu1 %1112, %v436_v17  }
  0x42   : > { %363 = vmatprep.subr.mxu0 %v1412_v8  ;;  %p1174_p7 = por %p1173_p6, %p1172_p0 }
  0x43   : > { %364 = vmatpush1.msra.mxu0 %v1421_v11 }
  0x44   : > { %998 = vmatmul.mubr.msk.f32.vlgmr.msra.gmra.mxu0 %vm320_vm0, %v292_v12  ;;  %445 = vperm.xlu0 %1111, %v435_v19   ;;  %p1175_p9 = pnand %p1174_p7, %p1168_p13 }
  0x45   : > { %403 = vmatprep.mubr.f32.mxu0 %v1255_v0  ;;  %440 = vperm.xlu1 %1112, %v434_v20  }
  0x48   : > { %999 = vmatmul.mubr.msk.f32.gmra.mxu0 %vm320_vm0, %v293_v15  ;;  %602 = vperm.xlu0 %1111, %v1009_v22  }
  0x49   : > { %409 = vmatprep.mubr.f32.mxu0 %v1255_v0  ;;  %597 = vperm.xlu1 %1112, %v1008_v23  }
  0x4c   : > { %1000 = vmatmul.mubr.msk.f32.gmra.mxu0 %vm320_vm0, %v294_v18  ;;  %592 = vperm.xlu0 %1111, %v1007_v24  }
  0x4d   : > { %415 = vmatprep.mubr.f32.mxu0 %v1255_v0  ;;  %587 = vperm.xlu1 %1112, %v1006_v25  }
  0x50   : > { %1001 = vmatmul.mubr.msk.f32.gmra.mxu0 %vm320_vm0, %v295_v21  ;;  %726 = vperm.xlu0 %1111, %v1014_v26  }
  0x51   : > { %681 = vmatprep.mubr.f32.mxu0 %v1255_v0  ;;  %731 = vperm.xlu1 %1112, %v1015_v27  }
  0x54   : > { %736 = vperm.xlu0 %1111, %v1016_v28  }
  0x55   : > { %741 = vperm.xlu1 %1112, %v1017_v29  }
  0xb3   : > { %v318_v34 = vpop.permute.xlu0 %317  ;;  %v308_v37 = vpop.permute.xlu1 %307 }
  0xb7   : > { %v313_v39 = vpop.permute.xlu0 %312 }
  0xb8   : > { %v303_v47 = vpop.permute.xlu1 %302 }
  0xbb   : > { %v456_v10 = vpop.permute.xlu0 %455 }
  0xbc   : > { %v451_v13 = vpop.permute.xlu1 %450 }
  0xbf   : > { %v446_v18 = vpop.permute.xlu0 %445 }
  0xc0   : > { %v441_v23 = vpop.permute.xlu1 %440 }
 0x104   : > { %v399_v30 = vpop.f32.mrf.mxu0 }
 0x105   : > { %v400_v52 = vadd.f32 %v399_v30, %v303_v47 }
 0x106   : > { %v401_v31 = vpop.f32.mrf.mxu0 }
 0x107   : > { %v402_v50 = vadd.f32 %v401_v31, %v303_v47  ;;  %v422_v57 = vmax.f32 %v400_v52, 0.0 }
 0x108   : > { %v405_v32 = vpop.f32.mrf.mxu0 }
 0x109   : > { %v406_v48 = vadd.f32 %v405_v32, %v308_v37  ;;  %v423_v56 = vmax.f32 %v402_v50, 0.0 }
 0x10a   : > { %v407_v33 = vpop.f32.mrf.mxu0 }
 0x10b   : > { %v408_v45 = vadd.f32 %v407_v33, %v308_v37  ;;  %v424_v55 = vmax.f32 %v406_v48, 0.0  ;;  %v578_v37 = vld [vmem:[#allocation2 + $0x30] sm:$0xff] }
 0x10c   : > { %v411_v35 = vpop.f32.mrf.mxu0 }
 0x10d   : > { %v412_v44 = vadd.f32 %v411_v35, %v313_v39  ;;  %v425_v54 = vmax.f32 %v408_v45, 0.0  ;;  %v576_v35 = vld [vmem:[#allocation2 + $0x20] sm:$0xff] }
 0x10e   : > { %v413_v36 = vpop.f32.mrf.mxu0 }
 0x10f   : > { %v414_v42 = vadd.f32 %v413_v36, %v313_v39  ;;  %v426_v53 = vmax.f32 %v412_v44, 0.0  ;;  %v577_v36 = vld [vmem:[#allocation2 + $0x28] sm:$0xff]  ;;  %v603_v44 = vpop.permute.xlu0 %602 }
 0x110   : > { %v417_v38 = vpop.f32.mrf.mxu0 }
 0x111   : > { %v418_v40 = vadd.f32 %v417_v38, %v318_v34  ;;  %v427_v51 = vmax.f32 %v414_v42, 0.0  ;;  %v579_v38 = vld [vmem:[#allocation2 + $0x38] sm:$0xff] }
 0x112   : > { %v419_v41 = vpop.f32.mrf.mxu0 }
 0x113   : > { %v420_v43 = vadd.f32 %v419_v41, %v318_v34  ;;  %v428_v49 = vmax.f32 %v418_v40, 0.0  ;;  %v593_v52 = vpop.permute.xlu0 %592 }
 0x115   : > { %v429_v46 = vmax.f32 %v420_v43, 0.0 }
 0x117   : > { %494 = vmatprep.subr.mxu1 %v429_v46  ;;  %v598_v46 = vpop.permute.xlu1 %597 }
 0x118   : > { %495 = vmatpush1.msra.mxu1 %v428_v49 }
 0x119   : > { %496 = vmatprep.subr.mxu1 %v427_v51 }
 0x11a   : > { %497 = vmatpush1.msra.mxu1 %v426_v53 }
 0x11b   : > { %498 = vmatprep.subr.mxu1 %v425_v54 }
 0x11c   : > { %499 = vmatpush1.msra.mxu1 %v424_v55 }
 0x11d   : > { %500 = vmatprep.subr.mxu1 %v423_v56  ;;  %v588_v56 = vpop.permute.xlu1 %587 }
 0x11e   : > { %501 = vmatpush1.msra.mxu1 %v422_v57 }
 0x11f   : > { %1002 = vmatmul.mubr.msk.f32.vlgmr.msra.gmra.mxu1 %vm320_vm0, %v430_v58 }
 0x120   : > { %540 = vmatprep.mubr.f32.mxu1 %v1255_v0 }
 0x123   : > { %1003 = vmatmul.mubr.msk.f32.gmra.mxu1 %vm320_vm0, %v431_v59 }
 0x124   : > { %546 = vmatprep.mubr.f32.mxu1 %v1255_v0 }
 0x127   : > { %1004 = vmatmul.mubr.msk.f32.gmra.mxu1 %vm320_vm0, %v432_v60 }
 0x128   : > { %552 = vmatprep.mubr.f32.mxu1 %v1255_v0 }
 0x12b   : > { %1005 = vmatmul.mubr.msk.f32.gmra.mxu1 %vm320_vm0, %v433_v61 }
 0x12c   : > { %820 = vmatprep.mubr.f32.mxu1 %v1255_v0 }
 0x1df   : > { %v536_v62 = vpop.f32.mrf.mxu1 }
 0x1e0   : > { %v537_v29 = vadd.f32 %v536_v62, %v441_v23 }
 0x1e1   : > { %v538_v63 = vpop.f32.mrf.mxu1 }
 0x1e2   : > { %v539_v26 = vadd.f32 %v538_v63, %v441_v23 }
 0x1e3   : > { %v542_v1 = vpop.f32.mrf.mxu1 }
 0x1e4   : > { %v543_v24 = vadd.f32 %v542_v1, %v446_v18 }
 0x1e5   : > { %v544_v9 = vpop.f32.mrf.mxu1 }
 0x1e6   : > { %v545_v21 = vadd.f32 %v544_v9, %v446_v18  ;;  %v1501_v33 = vadd.f32 %v543_v24, %v1409_v7 }
 0x1e7   : > { %v548_v12 = vpop.f32.mrf.mxu1 }
 0x1e8   : > { %v549_v19 = vadd.f32 %v548_v12, %v451_v13  ;;  %v1497_v31 = vadd.f32 %v545_v21, %v1406_v6  ;;  %v715_v12 = vld [vmem:[#allocation5 + $0x20] sm:$0xff] }
 0x1e9   : > { %v550_v14 = vpop.f32.mrf.mxu1 }
 0x1ea   : > { %v551_v16 = vadd.f32 %v550_v14, %v451_v13  ;;  %v1494_v30 = vadd.f32 %v549_v19, %v1403_v5  ;;  %v1511_v5 = vadd.f32 %v537_v29, %v1421_v11  ;;  %v570_v7 = vmax.f32 %v1497_v31, 0.0  ;;  %v716_v13 = vld [vmem:[#allocation5 + $0x28] sm:$0xff]  ;;  %v717_v14 = vld [vmem:[#allocation5 + $0x30] sm:$0xff] }
 0x1eb   : > { %v554_v15 = vpop.f32.mrf.mxu1 }
 0x1ec   : > { %v555_v17 = vadd.f32 %v554_v15, %v456_v10  ;;  %v1488_v27 = vadd.f32 %v551_v16, %v1400_v4  ;;  %v1505_v4 = vadd.f32 %v539_v26, %v1412_v8  ;;  %v571_v6 = vmax.f32 %v1494_v30, 0.0  ;;  %v718_v15 = vld [vmem:[#allocation5 + $0x38] sm:$0xff]  ;;  %v727_v16 = vpop.permute.xlu0 %726 }
 0x1ed   : > { %v556_v20 = vpop.f32.mrf.mxu1  ;;  %v569_v8 = vmax.f32 %v1501_v33, 0.0  ;;  %v567_v11 = vmax.f32 %v1511_v5, 0.0 }
 0x1ee   : > { %v557_v22 = vadd.f32 %v556_v20, %v456_v10  ;;  %v1485_v25 = vadd.f32 %v555_v17, %v1398_v3  ;;  %v568_v34 = vmax.f32 %v1505_v4, 0.0 }
 0x1f0   : > { %v1491_v28 = vadd.f32 %v557_v22, %v1396_v2  ;;  %v573_v3 = vmax.f32 %v1485_v25, 0.0  ;;  %v572_v2 = vmax.f32 %v1488_v27, 0.0  ;;  %v732_v22 = vpop.permute.xlu1 %731 }
 0x1f2   : > { %v574_v32 = vmax.f32 %v1491_v28, 0.0 }
 0x1f4   : > { %641 = vmatprep.subr.mxu0 %v574_v32 }
 0x1f5   : > { %642 = vmatpush1.msra.mxu0 %v573_v3 }
 0x1f6   : > { %643 = vmatprep.subr.mxu0 %v572_v2 }
 0x1f7   : > { %644 = vmatpush1.msra.mxu0 %v571_v6 }
 0x1f8   : > { %645 = vmatprep.subr.mxu0 %v570_v7 }
 0x1f9   : > { %646 = vmatpush1.msra.mxu0 %v569_v8 }
 0x1fa   : > { %647 = vmatprep.subr.mxu0 %v568_v34 }
 0x1fb   : > { %648 = vmatpush1.msra.mxu0 %v567_v11 }
 0x1fc   : > { %1010 = vmatmul.mubr.msk.f32.vlgmr.msra.gmra.mxu0 %vm320_vm0, %v576_v35 }
 0x1fd   : > { %687 = vmatprep.mubr.f32.mxu0 %v1255_v0 }
 0x200   : > { %1011 = vmatmul.mubr.msk.f32.gmra.mxu0 %vm320_vm0, %v577_v36  ;;  %v737_v36 = vpop.permute.xlu0 %736 }
 0x201   : > { %693 = vmatprep.mubr.f32.mxu0 %v1255_v0 }
 0x204   : > { %1012 = vmatmul.mubr.msk.f32.gmra.mxu0 %vm320_vm0, %v578_v37 }
 0x205   : > { %699 = vmatprep.mubr.f32.mxu0 %v1255_v0 }
 0x208   : > { %1013 = vmatmul.mubr.msk.f32.gmra.mxu0 %vm320_vm0, %v579_v38 }
 0x2bc   : > { %v683_v39 = vpop.f32.mrf.mxu0 }
 0x2bd   : > { %v684_v61 = vadd.f32 %v683_v39, %v588_v56 }
 0x2be   : > { %v685_v40 = vpop.f32.mrf.mxu0 }
 0x2bf   : > { %v686_v59 = vadd.f32 %v685_v40, %v588_v56  ;;  %v706_v10 = vmax.f32 %v684_v61, 0.0 }
 0x2c0   : > { %v689_v41 = vpop.f32.mrf.mxu0 }
 0x2c1   : > { %v690_v57 = vadd.f32 %v689_v41, %v593_v52  ;;  %v707_v9 = vmax.f32 %v686_v59, 0.0  ;;  %v742_v41 = vpop.permute.xlu1 %741 }
 0x2c2   : > { %v691_v42 = vpop.f32.mrf.mxu0 }
 0x2c3   : > { %v692_v54 = vadd.f32 %v691_v42, %v593_v52  ;;  %v708_v1 = vmax.f32 %v690_v57, 0.0 }
 0x2c4   : > { %v695_v43 = vpop.f32.mrf.mxu0 }
 0x2c5   : > { %v696_v53 = vadd.f32 %v695_v43, %v598_v46  ;;  %v709_v63 = vmax.f32 %v692_v54, 0.0 }
 0x2c6   : > { %v697_v45 = vpop.f32.mrf.mxu0 }
 0x2c7   : > { %v698_v50 = vadd.f32 %v697_v45, %v598_v46  ;;  %v710_v62 = vmax.f32 %v696_v53, 0.0 }
 0x2c8   : > { %v701_v47 = vpop.f32.mrf.mxu0 }
 0x2c9   : > { %v702_v48 = vadd.f32 %v701_v47, %v603_v44  ;;  %v711_v60 = vmax.f32 %v698_v50, 0.0 }
 0x2ca   : > { %v703_v49 = vpop.f32.mrf.mxu0 }
 0x2cb   : > { %v704_v51 = vadd.f32 %v703_v49, %v603_v44  ;;  %v712_v58 = vmax.f32 %v702_v48, 0.0 }
 0x2cd   : > { %v713_v55 = vmax.f32 %v704_v51, 0.0 }
 0x2cf   : > { %780 = vmatprep.subr.mxu1 %v713_v55 }
 0x2d0   : > { %781 = vmatpush1.msra.mxu1 %v712_v58 }
 0x2d1   : > { %782 = vmatprep.subr.mxu1 %v711_v60 }
 0x2d2   : > { %783 = vmatpush1.msra.mxu1 %v710_v62 }
 0x2d3   : > { %784 = vmatprep.subr.mxu1 %v709_v63 }
 0x2d4   : > { %785 = vmatpush1.msra.mxu1 %v708_v1 }
 0x2d5   : > { %786 = vmatprep.subr.mxu1 %v707_v9 }
 0x2d6   : > { %787 = vmatpush1.msra.mxu1 %v706_v10 }
 0x2d7   : > { %1018 = vmatmul.mubr.msk.f32.vlgmr.msra.gmra.mxu1 %vm320_vm0, %v715_v12 }
 0x2d8   : > { %826 = vmatprep.mubr.f32.mxu1 %v1255_v0 }
 0x2db   : > { %1019 = vmatmul.mubr.msk.f32.gmra.mxu1 %vm320_vm0, %v716_v13 }
 0x2dc   : > { %832 = vmatprep.mubr.f32.mxu1 %v1255_v0 }
 0x2df   : > { %1020 = vmatmul.mubr.msk.f32.gmra.mxu1 %vm320_vm0, %v717_v14 }
 0x2e0   : > { %838 = vmatprep.mubr.f32.mxu1 %v1255_v0 }
 0x2e3   : > { %1021 = vmatmul.mubr.msk.f32.gmra.mxu1 %vm320_vm0, %v718_v15 }
 0x397   : > { %v822_v17 = vpop.f32.mrf.mxu1 }
 0x398   : > { %v823_v18 = vadd.f32 %v822_v17, %v727_v16 }
 0x399   : > { %v824_v19 = vpop.f32.mrf.mxu1 }
 0x39a   : > { %v845_v20 = vadd.f32 %v823_v18, %v567_v11  ;;  %v825_v21 = vadd.f32 %v824_v19, %v727_v16 }
 0x39b   : > { %v828_v23 = vpop.f32.mrf.mxu1 }
 0x39c   : > { %v853_v24 = vmax.f32 %v845_v20, 0.0  ;;  %v846_v0 = vadd.f32 %v825_v21, %v568_v34  ;;  %v829_v26 = vadd.f32 %v828_v23, %v732_v22 }
 0x39d   : > { %v830_v29 = vpop.f32.mrf.mxu1 }
 0x39e   : > { %861 = vst [vmem:[%s1553_s16] sm:$0xff] %v853_v24  ;;  %v854_v35 = vmax.f32 %v846_v0, 0.0  ;;  %v847_v5 = vadd.f32 %v829_v26, %v569_v8  ;;  %v831_v11 = vadd.f32 %v830_v29, %v732_v22 }
 0x39f   : > { %v834_v37 = vpop.f32.mrf.mxu1 }
 0x3a0   : > { %862 = vst [vmem:[%s1553_s16 + $0x8] sm:$0xff] %v854_v35  ;;  %v855_v4 = vmax.f32 %v847_v5, 0.0  ;;  %v848_v34 = vadd.f32 %v831_v11, %v570_v7  ;;  %v835_v38 = vadd.f32 %v834_v37, %v737_v36 }
 0x3a1   : > { %v836_v39 = vpop.f32.mrf.mxu1 }
 0x3a2   : > { %863 = vst [vmem:[%s1553_s16 + $0x10] sm:$0xff] %v855_v4  ;;  %v856_v40 = vmax.f32 %v848_v34, 0.0  ;;  %v849_v33 = vadd.f32 %v835_v38, %v571_v6  ;;  %v837_v8 = vadd.f32 %v836_v39, %v737_v36 }
 0x3a3   : > { %v840_v42 = vpop.f32.mrf.mxu1 }
 0x3a4   : > { %864 = vst [vmem:[%s1553_s16 + $0x18] sm:$0xff] %v856_v40  ;;  %v857_v43 = vmax.f32 %v849_v33, 0.0  ;;  %v850_v31 = vadd.f32 %v837_v8, %v572_v2  ;;  %v841_v7 = vadd.f32 %v840_v42, %v742_v41 }
 0x3a5   : > { %v842_v44 = vpop.f32.mrf.mxu1 }
 0x3a6   : > { %865 = vst [vmem:[%s1553_s16 + $0x20] sm:$0xff] %v857_v43  ;;  %v858_v45 = vmax.f32 %v850_v31, 0.0  ;;  %v851_v30 = vadd.f32 %v841_v7, %v573_v3  ;;  %v843_v6 = vadd.f32 %v842_v44, %v742_v41 }
 0x3a8   : > { %866 = vst [vmem:[%s1553_s16 + $0x28] sm:$0xff] %v858_v45  ;;  %v859_v46 = vmax.f32 %v851_v30, 0.0  ;;  %v852_v47 = vadd.f32 %v843_v6, %v574_v32 }
 0x3aa   : > { %867 = vst [vmem:[%s1553_s16 + $0x30] sm:$0xff] %v859_v46  ;;  %v860_v25 = vmax.f32 %v852_v47, 0.0 }
 0x3ac   : > { %868 = vst [vmem:[%s1553_s16 + $0x38] sm:$0xff] %v860_v25 }
 0x3ad   : > { %1178 = shalt.err (!%p1175_p9)
}
 0x3ae   : > { %s1179_s12 = scalar_lea.hbm %s1580_s29, 1024  ;;  %s1183_s14 = scalar_lea.hbm %s1636_s5, 2048 }
 0x3af   : > { %p1180_p12 = scmp.ne.s32.totalorder %s1580_s29, %s1179_s12  ;;  %p1184_p5 = scmp.lt.s32.totalorder %s1580_s29, %s1636_s5 }
 0x3b0   : > { %p1185_p3 = scmp.lt.s32.totalorder %s1183_s14, %s1179_s12 }
 0x3b1   : > { %p1181_p1 = pnand %p1180_p12, %p1643_p10 }
 0x3b2   : > { %p1186_p4 = por %p1185_p3, %p1184_p5 }
 0x3b3   : > { %p1182_p2 = pneg %p1181_p1 }
 0x3b5   : > { %p1187_p8 = pnand %p1186_p4, %p1182_p2 }
 0x3b7   : > { %1190 = shalt.err (!%p1187_p8)
}
 0x3b8   : > { %s1258_s24 = smov 256   ;;  %s1259_s25 = smov 16  }
 0x3b9   : > { %1037 = dma.vmem_to_hbm [thread:$0]  (%p1643_p10), %s1575_s17, 1024, %s1580_s29, %s1586_s21, %s1258_s24, %s1258_s24, %s1259_s25  }
 0x3ba PF: > { %p1054_p11 = scmp.ge.s32.totalorder %s1249_s23, 2  ;;  %s900_s27 = sand.u32 1, %s1229_s18  }
 0x3bb   : > { %p1644_p13 = scmp.ne.s32.totalorder %s1639_s30, 0  ;;  %s901_s7 = scalar_lea.sflag [#allocation4], %s900_s27 }
 0x3bd   : > { %p1047_p0 = pnand %p1054_p11, %p1644_p13 }
 0x3bf   : > { %p1048_p6 = pneg %p1047_p0 }
 0x3c1   : > { %1224 = dma.done.wait (%p1048_p6), %s901_s7, 1024  }
 0x3c2   : > { %1226 = vsyncadd (%p1048_p6), %s901_s7, 4294966272  ;;  %s20_s23 = sadd.s32 1, %s1249_s23   ;;  %s1645_s18 = smov %s1233_s19 }
 0x3c3   : > { %p17_p7 = scmp.ge.s32.totalorder %s20_s23, 4   ;;  %s1646_s19 = smov %s1237_s20 }
 0x3c4   : > { %s1647_s20 = smov %s1343_s6  ;;  %s1648_s21 = smov %s1245_s22 }
 0x3c5   : > { %s1649_s22 = smov %s1651_s26  ;;  %19 = sbr.rel (!%p17_p7) target bundleno = 6 (0x6), region = 88 }
 0x3ca   :  { %906 = vsyncpa [#allocation3], 1 }
 0x3cb   :  { %908 = vsyncpa [#allocation3 + $0x1], 1 }
 0x3cc   :  { %909 = vsyncpa [#allocation6], 1 }
 0x3cd   :  { %910 = vsyncpa [#allocation4], 1 }
 0x3ce   :  { %912 = vsyncpa [#allocation4 + $0x1], 1 }

</bundles_post_ra>
